<compile_context>
chip_gen: v7x
topology: tpu7x:2x2x1
jax: 0.10.0
libtpu: 0.0.40
codegen_flags: <defaults>
</compile_context>

<pallas_src>
import functools

import jax
import jax.numpy as jnp
from jax.experimental import pallas as pl
from jax.experimental.pallas import tpu as pltpu


# --------------------------------------------------------------------------- #
# Pass 1: conv1(3x3x3) + folded BN + ReLU, one (sample, depth-slice) per step.
# --------------------------------------------------------------------------- #
def conv_bn_relu_kernel(x0_ref, x1_ref, x2_ref, w_ref, shift_ref,
                        y_ref, psum_ref, *, H, W, Cout):
    """x{kd}_ref : (3*Cin, (H+2)*W) bf16  padded depth slice d+kd, rows stacked kw-major.
       w_ref     : (3, 3, Cout, 3*Cin) bf16  BN-scale-folded conv1 weights.
       shift_ref : (Cout, 1) f32            folded conv bias + BN shift.
       y_ref     : (Cout, H*W) f32          before_mul for this (n, d) slice.
       psum_ref  : (Cout, 1) f32            per-slice channel sums (global avg pool)."""
    HW = H * W
    acc = jnp.zeros((Cout, HW), jnp.float32)
    for kd, x_ref in enumerate((x0_ref, x1_ref, x2_ref)):
        for kh in range(3):
            patch = x_ref[:, kh * W: kh * W + HW]            # (3*Cin, H*W) bf16
            acc = acc + jnp.dot(w_ref[kd, kh], patch,
                                preferred_element_type=jnp.float32)
    y = jnp.maximum(acc + shift_ref[...], 0.0)               # folded BN + ReLU
    y_ref[...] = y
    psum_ref[...] = jnp.sum(y, axis=1, keepdims=True)


# --------------------------------------------------------------------------- #
# Pass 2: out = before_mul * att + before_mul  ==  y * (1 + att)
# --------------------------------------------------------------------------- #
def apply_attention_kernel(y_ref, f_ref, o_ref):
    o_ref[...] = y_ref[...] * f_ref[...]


def feature_fusion_forward(x, params, pool_size=(1, 1, 1)):
    """x: [N, Cin, D, H, W] float32 (NCDHW, like PyTorch). Returns [N, Cout, D, H, W]."""
    assert pool_size == (1, 1, 1), "only global pooling (pool_size=(1,1,1)) supported"
    N, Cin, D, H, W = x.shape
    w1, b1, gamma, beta, rmean, rvar, eps, w2, b2, w3, b3 = params
    Cout = w1.shape[-1]
    HW = H * W
    M = D * HW

    # ---- fold BatchNorm (eval mode) + conv1 bias into weights / a per-channel shift ----
    scale = gamma / jnp.sqrt(rvar + eps)                         # [Cout]
    shift = (b1 - rmean) * scale + beta                          # [Cout]
    w1f = w1 * scale[None, None, None, None, :]                  # (3,3,3,Cin,Cout)
    # layout (kd, kh, Cout, kw*Cin + cin) to match the activation row stacking below
    wk = jnp.transpose(w1f, (0, 1, 4, 2, 3)).reshape(3, 3, Cout, 3 * Cin).astype(jnp.bfloat16)
    shift2 = shift.reshape(Cout, 1).astype(jnp.float32)

    # ---- activation: pad spatially, pre-shift along W (3 stacked copies, not 27x im2col) ----
    xp = jnp.pad(x, ((0, 0), (0, 0), (1, 1), (1, 1), (1, 1)))    # [N, Cin, D+2, H+2, W+2]
    xs = jnp.stack([xp[..., kw:kw + W] for kw in range(3)], axis=1)   # [N,3,Cin,D+2,H+2,W]
    xs = jnp.transpose(xs, (0, 3, 1, 2, 4, 5))                   # [N, D+2, 3, Cin, H+2, W]
    xs = xs.reshape(N, D + 2, 3 * Cin, (H + 2) * W).astype(jnp.bfloat16)
    # TODO(synk): the remaining 3x depth-halo re-read of xs could be removed with a manual
    #             rolling-slab DMA (memory_space=pl.ANY + make_async_copy); kept simple here.

    def x_spec(kd):
        return pl.BlockSpec((None, None, 3 * Cin, (H + 2) * W),
                            lambda n, d, kd=kd: (n, d + kd, 0, 0))

    row_spec = pl.BlockSpec((None, None, Cout, HW), lambda n, d: (n, d, 0, 0))
    psum_spec = pl.BlockSpec((None, None, Cout, 1), lambda n, d: (n, d, 0, 0))

    flops1 = 2 * N * M * (27 * Cin) * Cout
    bytes1 = (3 * N * D * 3 * Cin * (H + 2) * W * 2              # halo'd activation reads
              + int(wk.size) * 2 + Cout * 4
              + N * D * Cout * HW * 4 + N * D * Cout * 4)

    y_col, psum = pl.pallas_call(
        functools.partial(conv_bn_relu_kernel, H=H, W=W, Cout=Cout),
        out_shape=(jax.ShapeDtypeStruct((N, D, Cout, HW), jnp.float32),
                   jax.ShapeDtypeStruct((N, D, Cout, 1), jnp.float32)),
        grid=(N, D),
        in_specs=[x_spec(0), x_spec(1), x_spec(2),
                  pl.BlockSpec((3, 3, Cout, 3 * Cin), lambda n, d: (0, 0, 0, 0)),
                  pl.BlockSpec((Cout, 1), lambda n, d: (0, 0))],
        out_specs=(row_spec, psum_spec),
        compiler_params=pltpu.CompilerParams(
            dimension_semantics=("parallel", "parallel"),
            vmem_limit_bytes=32 * 1024 * 1024),
        cost_estimate=pl.CostEstimate(flops=flops1, transcendentals=0,
                                      bytes_accessed=bytes1),
    )(xs, xs, xs, wk, shift2)

    # ---- global pool + tiny attention MLP in plain JAX (two Cout x Cout matmuls) ----
    pooled = jnp.sum(psum[..., 0], axis=1) / float(M)            # [N, Cout]
    h = jnp.maximum(pooled @ w2 + b2, 0.0)                       # conv2 (1x1x1) + ReLU
    att = jax.nn.sigmoid(h @ w3 + b3)                            # conv3 (1x1x1) + sigmoid
    factor = (1.0 + att).reshape(N, Cout, 1).astype(jnp.float32)

    flops2 = N * M * Cout
    bytes2 = 2 * N * D * Cout * HW * 4 + N * Cout * 4
    out_col = pl.pallas_call(
        apply_attention_kernel,
        out_shape=jax.ShapeDtypeStruct((N, D, Cout, HW), jnp.float32),
        grid=(N, D),
        in_specs=[row_spec,
                  pl.BlockSpec((None, Cout, 1), lambda n, d: (n, 0, 0))],
        out_specs=row_spec,
        compiler_params=pltpu.CompilerParams(
            dimension_semantics=("parallel", "parallel"),
            vmem_limit_bytes=32 * 1024 * 1024),
        cost_estimate=pl.CostEstimate(flops=flops2, transcendentals=0,
                                      bytes_accessed=bytes2),
    )(y_col, factor)

    out = out_col.reshape(N, D, Cout, H, W)
    return jnp.transpose(out, (0, 2, 1, 3, 4))                   # back to NCDHW


def reference_forward(x, params):
    """Pure-JAX f32 reference of the module's math (for correctness check)."""
    w1, b1, gamma, beta, rmean, rvar, eps, w2, b2, w3, b3 = params
    w1_oi = jnp.transpose(w1, (4, 3, 0, 1, 2))                   # [Cout, Cin, 3,3,3]
    y = jax.lax.conv_general_dilated(
        x, w1_oi, window_strides=(1, 1, 1), padding=((1, 1),) * 3,
        dimension_numbers=('NCDHW', 'OIDHW', 'NCDHW'))
    bc = lambda v: v[None, :, None, None, None]
    y = y + bc(b1)
    y = (y - bc(rmean)) / jnp.sqrt(bc(rvar) + eps) * bc(gamma) + bc(beta)
    y = jnp.maximum(y, 0.0)
    p = jnp.mean(y, axis=(2, 3, 4))                              # adaptive_avg_pool3d (1,1,1)
    h = jnp.maximum(p @ w2 + b2, 0.0)
    a = jax.nn.sigmoid(h @ w3 + b3)[:, :, None, None, None]
    return y * a + y


if __name__ == "__main__":
    key = jax.random.PRNGKey(0)
    N, Cin, Cout, D, H, W = 2, 4, 8, 4, 8, 8
    ks = jax.random.split(key, 7)

    x = jax.random.normal(ks[0], (N, Cin, D, H, W), jnp.float32)

    # Deterministic synthetic parameters (shapes follow the nn.Module's __init__;
    # the 1x1x1 convs are represented as (Cout, Cout) matrices applied as pooled @ w,
    # i.e. w == conv.weight[:, :, 0, 0, 0].T — used identically in kernel and reference).
    w1 = 0.1 * jax.random.normal(ks[1], (3, 3, 3, Cin, Cout), jnp.float32)
    b1 = 0.1 * jax.random.normal(ks[2], (Cout,), jnp.float32)
    gamma = jnp.ones((Cout,), jnp.float32)       # BatchNorm3d default init / running stats
    beta = jnp.zeros((Cout,), jnp.float32)
    rmean = jnp.zeros((Cout,), jnp.float32)
    rvar = jnp.ones((Cout,), jnp.float32)
    eps = 1e-5
    w2 = 0.2 * jax.random.normal(ks[3], (Cout, Cout), jnp.float32)
    b2 = 0.1 * jax.random.normal(ks[4], (Cout,), jnp.float32)
    w3 = 0.2 * jax.random.normal(ks[5], (Cout, Cout), jnp.float32)
    b3 = 0.1 * jax.random.normal(ks[6], (Cout,), jnp.float32)
    params = (w1, b1, gamma, beta, rmean, rvar, eps, w2, b2, w3, b3)

    out = feature_fusion_forward(x, params, pool_size=(1, 1, 1))
    out = jax.block_until_ready(out)

    ref = jax.block_until_ready(reference_forward(x, params))
    assert out.shape == (N, Cout, D, H, W), out.shape
    # Tolerance accounts for the bf16 MXU GEMM (K = 27*Cin) vs the f32 reference.
    max_err = float(jnp.max(jnp.abs(out - ref)))
    if max_err > 5e-2:
        raise AssertionError(f"Pallas kernel mismatch vs reference, max abs err = {max_err}")

    print("KERNEL_OK")
</pallas_src>

<mosaic_0001>
module attributes {stable_mosaic.version = 11 : i64} {
  func.func @conv_bn_relu_kernel(%arg0: i32, %arg1: i32, %arg2: memref<1x1x12x80xbf16, #tpu.memory_space<vmem>>, %arg3: memref<1x1x12x80xbf16, #tpu.memory_space<vmem>>, %arg4: memref<1x1x12x80xbf16, #tpu.memory_space<vmem>>, %arg5: memref<3x3x8x12xbf16, #tpu.memory_space<vmem>>, %arg6: memref<8x1xf32, #tpu.memory_space<vmem>>, %arg7: memref<1x1x8x64xf32, #tpu.memory_space<vmem>>, %arg8: memref<1x1x8x1xf32, #tpu.memory_space<vmem>>) attributes {dimension_semantics = [#tpu.dimension_semantics<parallel>, #tpu.dimension_semantics<parallel>], iteration_bounds = array<i64: 2, 4>, scalar_prefetch = 0 : i64, scratch_operands = 0 : i64, tpu.core_type = #tpu.core_type<tc>, window_params = [{transform_indices = @transform_0, window_bounds = array<i64: 1, 1, 12, 80>}, {transform_indices = @transform_1, window_bounds = array<i64: 1, 1, 12, 80>}, {transform_indices = @transform_2, window_bounds = array<i64: 1, 1, 12, 80>}, {pipeline_mode = #tpu.pipeline_mode<synchronous>, transform_indices = @transform_3, window_bounds = array<i64: 3, 3, 8, 12>}, {pipeline_mode = #tpu.pipeline_mode<synchronous>, transform_indices = @transform_4, window_bounds = array<i64: 8, 1>}, {transform_indices = @transform_5, window_bounds = array<i64: 1, 1, 8, 64>}, {transform_indices = @transform_6, window_bounds = array<i64: 1, 1, 8, 1>}]} {
    %cst = arith.constant 0.000000e+00 : f32
    %0 = vector.broadcast %cst : f32 to vector<8x64xf32>
    %c0 = arith.constant 0 : index
    %c0_0 = arith.constant 0 : index
    %c0_1 = arith.constant 0 : index
    %c0_2 = arith.constant 0 : index
    %1 = vector.load %arg2[%c0, %c0_0, %c0_1, %c0_2] : memref<1x1x12x80xbf16, #tpu.memory_space<vmem>>, vector<1x1x12x64xbf16>
    %2 = vector.shape_cast %1 : vector<1x1x12x64xbf16> to vector<12x64xbf16>
    %c0_3 = arith.constant 0 : index
    %c0_4 = arith.constant 0 : index
    %c0_5 = arith.constant 0 : index
    %c0_6 = arith.constant 0 : index
    %3 = vector.load %arg5[%c0_3, %c0_4, %c0_5, %c0_6] : memref<3x3x8x12xbf16, #tpu.memory_space<vmem>>, vector<1x1x8x12xbf16>
    %4 = vector.shape_cast %3 : vector<1x1x8x12xbf16> to vector<8x12xbf16>
    %cst_7 = arith.constant dense<0.000000e+00> : vector<8x64xf32>
    %5 = tpu.matmul %4, %2, %cst_7 {dimension_numbers = #tpu.dot_dimension_numbers<[1], [0], [0], [1], [0, 0, 1, 1], [], []>} : vector<8x12xbf16>, vector<12x64xbf16>, vector<8x64xf32> -> vector<8x64xf32>
    %6 = arith.addf %0, %5 : vector<8x64xf32>
    %c0_8 = arith.constant 0 : index
    %c0_9 = arith.constant 0 : index
    %c0_10 = arith.constant 0 : index
    %c8 = arith.constant 8 : index
    %7 = vector.load %arg2[%c0_8, %c0_9, %c0_10, %c8] : memref<1x1x12x80xbf16, #tpu.memory_space<vmem>>, vector<1x1x12x64xbf16>
    %8 = vector.shape_cast %7 : vector<1x1x12x64xbf16> to vector<12x64xbf16>
    %c0_11 = arith.constant 0 : index
    %c1 = arith.constant 1 : index
    %c0_12 = arith.constant 0 : index
    %c0_13 = arith.constant 0 : index
    %9 = vector.load %arg5[%c0_11, %c1, %c0_12, %c0_13] : memref<3x3x8x12xbf16, #tpu.memory_space<vmem>>, vector<1x1x8x12xbf16>
    %10 = vector.shape_cast %9 : vector<1x1x8x12xbf16> to vector<8x12xbf16>
    %cst_14 = arith.constant dense<0.000000e+00> : vector<8x64xf32>
    %11 = tpu.matmul %10, %8, %cst_14 {dimension_numbers = #tpu.dot_dimension_numbers<[1], [0], [0], [1], [0, 0, 1, 1], [], []>} : vector<8x12xbf16>, vector<12x64xbf16>, vector<8x64xf32> -> vector<8x64xf32>
    %12 = arith.addf %6, %11 : vector<8x64xf32>
    %c0_15 = arith.constant 0 : index
    %c0_16 = arith.constant 0 : index
    %c0_17 = arith.constant 0 : index
    %c16 = arith.constant 16 : index
    %13 = vector.load %arg2[%c0_15, %c0_16, %c0_17, %c16] : memref<1x1x12x80xbf16, #tpu.memory_space<vmem>>, vector<1x1x12x64xbf16>
    %14 = vector.shape_cast %13 : vector<1x1x12x64xbf16> to vector<12x64xbf16>
    %c0_18 = arith.constant 0 : index
    %c2 = arith.constant 2 : index
    %c0_19 = arith.constant 0 : index
    %c0_20 = arith.constant 0 : index
    %15 = vector.load %arg5[%c0_18, %c2, %c0_19, %c0_20] : memref<3x3x8x12xbf16, #tpu.memory_space<vmem>>, vector<1x1x8x12xbf16>
    %16 = vector.shape_cast %15 : vector<1x1x8x12xbf16> to vector<8x12xbf16>
    %cst_21 = arith.constant dense<0.000000e+00> : vector<8x64xf32>
    %17 = tpu.matmul %16, %14, %cst_21 {dimension_numbers = #tpu.dot_dimension_numbers<[1], [0], [0], [1], [0, 0, 1, 1], [], []>} : vector<8x12xbf16>, vector<12x64xbf16>, vector<8x64xf32> -> vector<8x64xf32>
    %18 = arith.addf %12, %17 : vector<8x64xf32>
    %c0_22 = arith.constant 0 : index
    %c0_23 = arith.constant 0 : index
    %c0_24 = arith.constant 0 : index
    %c0_25 = arith.constant 0 : index
    %19 = vector.load %arg3[%c0_22, %c0_23, %c0_24, %c0_25] : memref<1x1x12x80xbf16, #tpu.memory_space<vmem>>, vector<1x1x12x64xbf16>
    %20 = vector.shape_cast %19 : vector<1x1x12x64xbf16> to vector<12x64xbf16>
    %c1_26 = arith.constant 1 : index
    %c0_27 = arith.constant 0 : index
    %c0_28 = arith.constant 0 : index
    %c0_29 = arith.constant 0 : index
    %21 = vector.load %arg5[%c1_26, %c0_27, %c0_28, %c0_29] : memref<3x3x8x12xbf16, #tpu.memory_space<vmem>>, vector<1x1x8x12xbf16>
    %22 = vector.shape_cast %21 : vector<1x1x8x12xbf16> to vector<8x12xbf16>
    %cst_30 = arith.constant dense<0.000000e+00> : vector<8x64xf32>
    %23 = tpu.matmul %22, %20, %cst_30 {dimension_numbers = #tpu.dot_dimension_numbers<[1], [0], [0], [1], [0, 0, 1, 1], [], []>} : vector<8x12xbf16>, vector<12x64xbf16>, vector<8x64xf32> -> vector<8x64xf32>
    %24 = arith.addf %18, %23 : vector<8x64xf32>
    %c0_31 = arith.constant 0 : index
    %c0_32 = arith.constant 0 : index
    %c0_33 = arith.constant 0 : index
    %c8_34 = arith.constant 8 : index
    %25 = vector.load %arg3[%c0_31, %c0_32, %c0_33, %c8_34] : memref<1x1x12x80xbf16, #tpu.memory_space<vmem>>, vector<1x1x12x64xbf16>
    %26 = vector.shape_cast %25 : vector<1x1x12x64xbf16> to vector<12x64xbf16>
    %c1_35 = arith.constant 1 : index
    %c1_36 = arith.constant 1 : index
    %c0_37 = arith.constant 0 : index
    %c0_38 = arith.constant 0 : index
    %27 = vector.load %arg5[%c1_35, %c1_36, %c0_37, %c0_38] : memref<3x3x8x12xbf16, #tpu.memory_space<vmem>>, vector<1x1x8x12xbf16>
    %28 = vector.shape_cast %27 : vector<1x1x8x12xbf16> to vector<8x12xbf16>
    %cst_39 = arith.constant dense<0.000000e+00> : vector<8x64xf32>
    %29 = tpu.matmul %28, %26, %cst_39 {dimension_numbers = #tpu.dot_dimension_numbers<[1], [0], [0], [1], [0, 0, 1, 1], [], []>} : vector<8x12xbf16>, vector<12x64xbf16>, vector<8x64xf32> -> vector<8x64xf32>
    %30 = arith.addf %24, %29 : vector<8x64xf32>
    %c0_40 = arith.constant 0 : index
    %c0_41 = arith.constant 0 : index
    %c0_42 = arith.constant 0 : index
    %c16_43 = arith.constant 16 : index
    %31 = vector.load %arg3[%c0_40, %c0_41, %c0_42, %c16_43] : memref<1x1x12x80xbf16, #tpu.memory_space<vmem>>, vector<1x1x12x64xbf16>
    %32 = vector.shape_cast %31 : vector<1x1x12x64xbf16> to vector<12x64xbf16>
    %c1_44 = arith.constant 1 : index
    %c2_45 = arith.constant 2 : index
    %c0_46 = arith.constant 0 : index
    %c0_47 = arith.constant 0 : index
    %33 = vector.load %arg5[%c1_44, %c2_45, %c0_46, %c0_47] : memref<3x3x8x12xbf16, #tpu.memory_space<vmem>>, vector<1x1x8x12xbf16>
    %34 = vector.shape_cast %33 : vector<1x1x8x12xbf16> to vector<8x12xbf16>
    %cst_48 = arith.constant dense<0.000000e+00> : vector<8x64xf32>
    %35 = tpu.matmul %34, %32, %cst_48 {dimension_numbers = #tpu.dot_dimension_numbers<[1], [0], [0], [1], [0, 0, 1, 1], [], []>} : vector<8x12xbf16>, vector<12x64xbf16>, vector<8x64xf32> -> vector<8x64xf32>
    %36 = arith.addf %30, %35 : vector<8x64xf32>
    %c0_49 = arith.constant 0 : index
    %c0_50 = arith.constant 0 : index
    %c0_51 = arith.constant 0 : index
    %c0_52 = arith.constant 0 : index
    %37 = vector.load %arg4[%c0_49, %c0_50, %c0_51, %c0_52] : memref<1x1x12x80xbf16, #tpu.memory_space<vmem>>, vector<1x1x12x64xbf16>
    %38 = vector.shape_cast %37 : vector<1x1x12x64xbf16> to vector<12x64xbf16>
    %c2_53 = arith.constant 2 : index
    %c0_54 = arith.constant 0 : index
    %c0_55 = arith.constant 0 : index
    %c0_56 = arith.constant 0 : index
    %39 = vector.load %arg5[%c2_53, %c0_54, %c0_55, %c0_56] : memref<3x3x8x12xbf16, #tpu.memory_space<vmem>>, vector<1x1x8x12xbf16>
    %40 = vector.shape_cast %39 : vector<1x1x8x12xbf16> to vector<8x12xbf16>
    %cst_57 = arith.constant dense<0.000000e+00> : vector<8x64xf32>
    %41 = tpu.matmul %40, %38, %cst_57 {dimension_numbers = #tpu.dot_dimension_numbers<[1], [0], [0], [1], [0, 0, 1, 1], [], []>} : vector<8x12xbf16>, vector<12x64xbf16>, vector<8x64xf32> -> vector<8x64xf32>
    %42 = arith.addf %36, %41 : vector<8x64xf32>
    %c0_58 = arith.constant 0 : index
    %c0_59 = arith.constant 0 : index
    %c0_60 = arith.constant 0 : index
    %c8_61 = arith.constant 8 : index
    %43 = vector.load %arg4[%c0_58, %c0_59, %c0_60, %c8_61] : memref<1x1x12x80xbf16, #tpu.memory_space<vmem>>, vector<1x1x12x64xbf16>
    %44 = vector.shape_cast %43 : vector<1x1x12x64xbf16> to vector<12x64xbf16>
    %c2_62 = arith.constant 2 : index
    %c1_63 = arith.constant 1 : index
    %c0_64 = arith.constant 0 : index
    %c0_65 = arith.constant 0 : index
    %45 = vector.load %arg5[%c2_62, %c1_63, %c0_64, %c0_65] : memref<3x3x8x12xbf16, #tpu.memory_space<vmem>>, vector<1x1x8x12xbf16>
    %46 = vector.shape_cast %45 : vector<1x1x8x12xbf16> to vector<8x12xbf16>
    %cst_66 = arith.constant dense<0.000000e+00> : vector<8x64xf32>
    %47 = tpu.matmul %46, %44, %cst_66 {dimension_numbers = #tpu.dot_dimension_numbers<[1], [0], [0], [1], [0, 0, 1, 1], [], []>} : vector<8x12xbf16>, vector<12x64xbf16>, vector<8x64xf32> -> vector<8x64xf32>
    %48 = arith.addf %42, %47 : vector<8x64xf32>
    %c0_67 = arith.constant 0 : index
    %c0_68 = arith.constant 0 : index
    %c0_69 = arith.constant 0 : index
    %c16_70 = arith.constant 16 : index
    %49 = vector.load %arg4[%c0_67, %c0_68, %c0_69, %c16_70] : memref<1x1x12x80xbf16, #tpu.memory_space<vmem>>, vector<1x1x12x64xbf16>
    %50 = vector.shape_cast %49 : vector<1x1x12x64xbf16> to vector<12x64xbf16>
    %c2_71 = arith.constant 2 : index
    %c2_72 = arith.constant 2 : index
    %c0_73 = arith.constant 0 : index
    %c0_74 = arith.constant 0 : index
    %51 = vector.load %arg5[%c2_71, %c2_72, %c0_73, %c0_74] : memref<3x3x8x12xbf16, #tpu.memory_space<vmem>>, vector<1x1x8x12xbf16>
    %52 = vector.shape_cast %51 : vector<1x1x8x12xbf16> to vector<8x12xbf16>
    %cst_75 = arith.constant dense<0.000000e+00> : vector<8x64xf32>
    %53 = tpu.matmul %52, %50, %cst_75 {dimension_numbers = #tpu.dot_dimension_numbers<[1], [0], [0], [1], [0, 0, 1, 1], [], []>} : vector<8x12xbf16>, vector<12x64xbf16>, vector<8x64xf32> -> vector<8x64xf32>
    %54 = arith.addf %48, %53 : vector<8x64xf32>
    %c0_76 = arith.constant 0 : index
    %c0_77 = arith.constant 0 : index
    %55 = vector.load %arg6[%c0_76, %c0_77] : memref<8x1xf32, #tpu.memory_space<vmem>>, vector<8x1xf32>
    %56 = vector.broadcast %55 : vector<8x1xf32> to vector<8x64xf32>
    %57 = arith.addf %54, %56 : vector<8x64xf32>
    %cst_78 = arith.constant 0.000000e+00 : f32
    %58 = vector.broadcast %cst_78 : f32 to vector<8x64xf32>
    %59 = arith.maximumf %57, %58 : vector<8x64xf32>
    %c0_79 = arith.constant 0 : index
    %c0_80 = arith.constant 0 : index
    %c0_81 = arith.constant 0 : index
    %c0_82 = arith.constant 0 : index
    %60 = vector.load %arg7[%c0_79, %c0_80, %c0_81, %c0_82] : memref<1x1x8x64xf32, #tpu.memory_space<vmem>>, vector<1x1x8x64xf32>
    %61 = vector.shape_cast %60 : vector<1x1x8x64xf32> to vector<8x64xf32>
    %62 = vector.shape_cast %59 : vector<8x64xf32> to vector<1x1x8x64xf32>
    tpu.vector_store %arg7[%c0_79, %c0_80, %c0_81, %c0_82], %62 {strides = array<i32>} : memref<1x1x8x64xf32, #tpu.memory_space<vmem>>, vector<1x1x8x64xf32>,
    %cst_83 = arith.constant dense<0.000000e+00> : vector<8xf32>
    %63 = vector.multi_reduction <add>, %59, %cst_83 [1] : vector<8x64xf32> to vector<8xf32>
    %64 = vector.shape_cast %63 : vector<8xf32> to vector<8x1xf32>
    %c0_84 = arith.constant 0 : index
    %c0_85 = arith.constant 0 : index
    %c0_86 = arith.constant 0 : index
    %c0_87 = arith.constant 0 : index
    %65 = vector.load %arg8[%c0_84, %c0_85, %c0_86, %c0_87] : memref<1x1x8x1xf32, #tpu.memory_space<vmem>>, vector<1x1x8x1xf32>
    %66 = vector.shape_cast %65 : vector<1x1x8x1xf32> to vector<8x1xf32>
    %67 = vector.shape_cast %64 : vector<8x1xf32> to vector<1x1x8x1xf32>
    tpu.vector_store %arg8[%c0_84, %c0_85, %c0_86, %c0_87], %67 {strides = array<i32>} : memref<1x1x8x1xf32, #tpu.memory_space<vmem>>, vector<1x1x8x1xf32>,
    return
  }
  func.func @transform_0(%arg0: i32, %arg1: i32) -> (i32, i32, i32, i32) {
    %c0_i32 = arith.constant 0 : i32
    %0 = arith.addi %arg1, %c0_i32 : i32
    %c0_i32_0 = arith.constant 0 : i32
    %c0_i32_1 = arith.constant 0 : i32
    %c0_i32_2 = arith.constant 0 : i32
    return %arg0, %0, %c0_i32_0, %c0_i32_1 : i32, i32, i32, i32
  }
  func.func @transform_1(%arg0: i32, %arg1: i32) -> (i32, i32, i32, i32) {
    %c1_i32 = arith.constant 1 : i32
    %0 = arith.addi %arg1, %c1_i32 : i32
    %c0_i32 = arith.constant 0 : i32
    %c0_i32_0 = arith.constant 0 : i32
    %c0_i32_1 = arith.constant 0 : i32
    return %arg0, %0, %c0_i32, %c0_i32_0 : i32, i32, i32, i32
  }
  func.func @transform_2(%arg0: i32, %arg1: i32) -> (i32, i32, i32, i32) {
    %c2_i32 = arith.constant 2 : i32
    %0 = arith.addi %arg1, %c2_i32 : i32
    %c0_i32 = arith.constant 0 : i32
    %c0_i32_0 = arith.constant 0 : i32
    %c0_i32_1 = arith.constant 0 : i32
    return %arg0, %0, %c0_i32, %c0_i32_0 : i32, i32, i32, i32
  }
  func.func @transform_3(%arg0: i32, %arg1: i32) -> (i32, i32, i32, i32) {
    %c0_i32 = arith.constant 0 : i32
    %c0_i32_0 = arith.constant 0 : i32
    %c0_i32_1 = arith.constant 0 : i32
    %c0_i32_2 = arith.constant 0 : i32
    %c0_i32_3 = arith.constant 0 : i32
    return %c0_i32, %c0_i32_0, %c0_i32_1, %c0_i32_2 : i32, i32, i32, i32
  }
  func.func @transform_4(%arg0: i32, %arg1: i32) -> (i32, i32) {
    %c0_i32 = arith.constant 0 : i32
    %c0_i32_0 = arith.constant 0 : i32
    %c0_i32_1 = arith.constant 0 : i32
    return %c0_i32, %c0_i32_0 : i32, i32
  }
  func.func @transform_5(%arg0: i32, %arg1: i32) -> (i32, i32, i32, i32) {
    %c0_i32 = arith.constant 0 : i32
    %c0_i32_0 = arith.constant 0 : i32
    %c0_i32_1 = arith.constant 0 : i32
    return %arg0, %arg1, %c0_i32, %c0_i32_0 : i32, i32, i32, i32
  }
  func.func @transform_6(%arg0: i32, %arg1: i32) -> (i32, i32, i32, i32) {
    %c0_i32 = arith.constant 0 : i32
    %c0_i32_0 = arith.constant 0 : i32
    %c0_i32_1 = arith.constant 0 : i32
    return %arg0, %arg1, %c0_i32, %c0_i32_0 : i32, i32, i32, i32
  }
}

</mosaic_0001>

<bundles_post_ra>
// kernel: tpu_custom_call.1
= control target key start
LH: loop header
LB: loop body
LE: loop exit
PB: predicated region body
PF: predicated region fallthrough
CT: control target
= control target key end

     0   :  { %s1608_s0 = inlined_call_operand.vmem [shape: bf16[2,6,12,80], index: 0, kind: input, shape index: {}]   ;;  %s1609_s1 = inlined_call_operand.vmem [shape: bf16[2,6,12,80], index: 1, kind: input, shape index: {}]   ;;  %s1610_s2 = inlined_call_operand.vmem [shape: bf16[2,6,12,80], index: 2, kind: input, shape index: {}]   ;;  %s1611_s3 = inlined_call_operand.vmem [shape: bf16[3,3,8,12], index: 3, kind: input, shape index: {}]   ;;  %s1612_s4 = inlined_call_operand.vmem [shape: f32[8,1], index: 4, kind: input, shape index: {}]   ;;  %s1613_s5 = inlined_call_operand.hbm [shape: f32[2,4,8,64], index: 5, kind: output, shape index: {0}]   ;;  %s1614_s6 = inlined_call_operand.vmem [shape: f32[2,4,8,1], index: 6, kind: output, shape index: {1}]  }
   0x1   :  { %1620 = sst [smem:[#allocation11_spill]] %s1608_s0 }
   0x2   :  { %12 = vsyncpa [#allocation3], 0 }
   0x3   :  { %14 = vsyncpa [#allocation3 + $0x1], 0  ;;  %s1385_s21 = smov 0   ;;  %s1387_s22 = smov 0  }
   0x4   :  { %s1389_s23 = smov 0   ;;  %s1391_s24 = smov 0  }
   0x5   :  { %s1393_s25 = smov 0   ;;  %s1395_s26 = smov 0  }
   0x6   :  { %s1397_s27 = smov 0   ;;  %s1399_s28 = smov 0  }
   0x7 LB: > { %1621 = sst [smem:[#allocation5_spill]] %s1322_s23  ;;  %s1056_s29 = sadd.s32 4294967295, %s1342_s28   ;;  %s1342_s28 = sphi %s1399_s28, %s20_s28   ;;  %s1338_s27 = sphi %s1397_s27, %s1635_s27   ;;  %s1334_s26 = sphi %s1395_s26, %s1634_s26   ;;  %s1330_s25 = sphi %s1393_s25, %s1633_s25   ;;  %s1326_s24 = sphi %s1391_s24, %s1638_s24   ;;  %s1322_s23 = sphi %s1389_s23, %s1631_s23   ;;  %s1318_s22 = sphi %s1387_s22, %s1637_s22   ;;  %s1314_s21 = sphi %s1385_s21, %s1636_s21  }
   0x8   : > { %1622 = sst [smem:[#allocation6_spill]] %s1334_s26  ;;  %s1057_s30 = sadd.s32 4294967294, %s1342_s28  }
   0x9   : > { %1623 = sst [smem:[#allocation7_spill]] %s1338_s27  ;;  %s29_s7 = sadd.s32 1, %s1334_s26 }
   0xa   : > { %p30_p0 = scmp.ge.s32.totalorder %s29_s7, 4  ;;  %s32_s8 = sadd.s32 1, %s1338_s27 }
   0xb   : > { %p181_p1 = scmp.ne.s32.totalorder %s1322_s23, %s1318_s22  ;;  %p182_p2 = scmp.eq.s32.totalorder %s1056_s29, 7 }
   0xc   : > { %s1640_s7 = smov (%p30_p0, %s29_s7), 0  ;;  %s1642_s8 = smov (!%p30_p0, %s32_s8), %s1338_s27 }
   0xd   : > { %1624 = sst [smem:[#allocation8_spill]] %s1640_s7  ;;  %s167_s9 = ssub.s32 %s1334_s26, %s1640_s7 }
   0xe   : > { %p1436_p3 = por %p182_p2, %p181_p1  ;;  %p34_p4 = scmp.ge.s32.totalorder %s1642_s8, 2 }
   0xf   : > { %p187_p5 = scmp.ne.s32.totalorder %s1318_s22, %s1314_s21  ;;  %p188_p6 = scmp.eq.s32.totalorder %s1057_s30, 7 }
  0x10   : > { %p1060_p7 = scmp.ge.s32.totalorder %s1342_s28, 1  ;;  %s1644_s8 = smov (%p34_p4, %s1642_s8), 0 }
  0x11   : > { %1626 = sst [smem:[#allocation9_spill]] %s1644_s8  ;;  %p1445_p8 = por %p188_p6, %p187_p5 }
  0x12   : > { %p280_p9 = scmp.lt.s32.totalorder %s1342_s28, 9  ;;  %s166_s12 = ssub.s32 %s1338_s27, %s1644_s8 }
  0x13   : > { %s171_s13 = sadd.s32 1, %s1322_s23  ;;  %s168_s14 = sor.u32 %s167_s9, %s166_s12 }
  0x14   : > { %p281_p10 = pnand %p1060_p7, %p280_p9  ;;  %p169_p11 = scmp.eq.s32.totalorder %s168_s14, 0 }
  0x15   : > { %p342_p12 = scmp.lt.s32.totalorder (!%p281_p10), %s1330_s25, 1  ;;  %p344_p13 = scmp.lt.s32.totalorder (!%p281_p10), %s1326_s24, 5  ;;  %v1344_v0 = vmov (!%p281_p10), 0.0   ;;  %vm1345_vm0 = vmmov (!%p281_p10), 0   ;;  %vm398_vm1 = vcmask (!%p281_p10), 1045504   ;;  %vm394_vm2 = vcmask (!%p281_p10), 97280  }
  0x16   : > { %s1454_s15 = scalar_select %p169_p11, %s1322_s23, %s171_s13  }
  0x17   : > { %284 = sbr.rel (%p281_p10) target bundleno = 551 (0x227), region = 40  ;;  %1113 = vmatprep.subr.bf16.mxu0 (!%p281_p10), %v1344_v0  ;;  %1119 = vmatprep.subr.bf16.mxu1 (!%p281_p10), %v1344_v0  ;;  %s351_s19 = sadd.s32 (!%p281_p10), 1, %s1326_s24  ;;  %v384_v3 = vld [vmem:[%s1611_s3] sm:$0xf] (!%p281_p10)  ;;  %v1076_v7 = vld [vmem:[%s1611_s3 + $0xc] sm:$0xf] (!%p281_p10) }
  0x18   : > { %1628 = sst [smem:[#allocation10_spill]] %s1454_s15  ;;  %1115 = vmatprep.mubr.msk.bf16.mxu0 (!%p281_p10), %vm1345_vm0, %v1344_v0  ;;  %1121 = vmatprep.mubr.msk.bf16.mxu1 (!%p281_p10), %vm1345_vm0, %v1344_v0  ;;  %p354_p0 = scmp.lt.s32.totalorder (!%p281_p10), %s351_s19, 5  ;;  %v855_v8 = vld [vmem:[%s1612_s4] sm:$0xff] (!%p281_p10)  ;;  %v1348_v9 = vmov (!%p281_p10), 0   ;;  %v1074_v16 = vld [vmem:[%s1611_s3 + $0x8] sm:$0xf] (!%p281_p10) }
  0x19   : > { %s362_s30 = sadd.s32 (!%p281_p10), 2, %s1326_s24  ;;  %s1629_s0 = sld [smem:[#allocation11_spill]] (!%p281_p10)  ;;  %1244 = vset.pattern.permute.xlu0 (!%p281_p10), %v1348_v9  ;;  %v1070_v12 = vld [vmem:[%s1611_s3 + $0x4] sm:$0xf] (!%p281_p10)  ;;  %v1081_v21 = vld [vmem:[%s1611_s3 + $0x14] sm:$0xf] (!%p281_p10) }
  0x1a   : > { %p365_p1 = scmp.lt.s32.totalorder (!%p281_p10), %s362_s30, 5  ;;  %s1346_s8 = smov (!%p281_p10), 120   ;;  %v1079_v23 = vld [vmem:[%s1611_s3 + $0x10] sm:$0xf] (!%p281_p10)  ;;  %v1086_v25 = vld [vmem:[%s1611_s3 + $0x1c] sm:$0xf] (!%p281_p10) }
  0x1b   : > { %s1347_s13 = smov (!%p281_p10), 112   ;;  %v1083_v27 = vld [vmem:[%s1611_s3 + $0x18] sm:$0xf] (!%p281_p10)  ;;  %v1088_v29 = vld [vmem:[%s1611_s3 + $0x20] sm:$0xf] (!%p281_p10)  ;;  %vm863_vm3 = vcmask (!%p281_p10), 523264  }
  0x1e   : > { %s1461_s16 = scalar_select %p342_p12, %s1330_s25, 1 }
  0x1f   : > { %s345_s17 = scalar_select %p344_p13, %s1326_s24, 5 }
  0x20   : > { %s1167_s18 = smul.u32 12, %s1461_s16  ;;  %s1646_s19 = smov (!%p354_p0, %s351_s19), 5 }
  0x21   : > { %s1062_s20 = sshll.u32 %s345_s17, 1  ;;  %s1648_s30 = smov (!%p365_p1, %s362_s30), 5 }
  0x22   : > { %s348_s29 = sadd.s32 %s1167_s18, %s1062_s20  ;;  %s1064_s7 = sshll.u32 %s1646_s19, 1 }
  0x23   : > { %s1063_s9 = sshll.u32 %s348_s29, 2  ;;  %s358_s29 = sadd.s32 %s1167_s18, %s1064_s7 }
  0x24   : > { %s350_s14 = scalar_lea.vmem %s1629_s0, %s1063_s9  ;;  %s1066_s27 = sshll.u32 %s1648_s30, 1 }
  0x25   : > { %v1245_v1 = vld [vmem:[%s350_s14] sm:$0x3f]   ;;  %s1065_s9 = sshll.u32 %s358_s29, 2  ;;  %s369_s12 = sadd.s32 %s1167_s18, %s1066_s27 }
  0x26   : > { %392 = vrot.lane.b32.xlu0 %v1245_v1, %s1346_s8  ;;  %v446_v2 = vsel %vm398_vm1, %v1245_v1, 0  ;;  %s360_s26 = scalar_lea.vmem %s1609_s1, %s1065_s9  ;;  %s1067_s15 = sshll.u32 %s369_s12, 2 }
  0x27   : > { %1120 = vmatpush3.bf16.msra.mxu1 %v446_v2  ;;  %v1246_v4 = vld [vmem:[%s360_s26] sm:$0x3f]   ;;  %s371_s17 = scalar_lea.vmem %s1610_s2, %s1067_s15  ;;  %s329_s0 = sand.u32 1, %s1318_s22  }
  0x28   : > { %1131 = vmatprep.subr.bf16.mxu1 %v1344_v0  ;;  %v1247_v5 = vld [vmem:[%s371_s17] sm:$0x3f]   ;;  %597 = vrot.lane.b32.xlu1 %v1246_v4, %s1346_s8  ;;  %v552_v6 = vsel %vm398_vm1, %v1246_v4, 0  ;;  %s1061_s23 = sshll.u32 %s329_s0, 3  ;;  %s1091_s7 = sshll.u32 %s1330_s25, 2 }
  0x29   : > { %v710_v24 = vsel %vm398_vm1, %v1247_v5, 0  ;;  %s331_s26 = scalar_lea.vmem [#allocation2], %s1061_s23  ;;  %s871_s9 = scalar_lea.sflag [#allocation3], %s329_s0 }
  0x2a   : > { %490 = vrot.lane.b32.xlu0 %v1245_v1, %s1347_s13  ;;  %1122 = vmatmul.mubr.msk.bf16.vlgmr.msra.gmra.mrb[0].mxu1 %vm394_vm2, %v384_v3  ;;  %s894_s18 = sshll.u32 %s331_s26, 4  ;;  %s895_s18 = int_to_ptr.vmem [resolvable:$true] %s894_s18 }
  0x2b   : > { %1133 = vmatprep.mubr.msk.bf16.mxu1 %vm1345_vm0, %v1344_v0  ;;  %1132 = vmatpush3.bf16.msra.mxu1 %v552_v6  ;;  %s1248_s12 = scalar_lea.vmem %s895_s18, 128 }
  0x2c   : > { %1143 = vmatprep.subr.bf16.mxu1 %v1344_v0  ;;  %648 = vrot.lane.b32.xlu1 %v1246_v4, %s1347_s13  ;;  %p1249_p2 = scmp.ne.s32.totalorder %s895_s18, %s1248_s12 }
  0x2e   : > { %755 = vrot.lane.b32.xlu0 %v1247_v5, %s1346_s8  ;;  %s890_s8 = sadd.s32 %s1326_s24, %s1091_s7  ;;  %p1250_p4 = pnand %p1249_p2, %p1436_p3 }
  0x2f   : > { %s1092_s15 = sshll.u32 %s890_s8, 7 }
  0x30   : > { %806 = vrot.lane.b32.xlu1 %v1247_v5, %s1347_s13  ;;  %s1555_s29 = scalar_lea.hbm %s1613_s5, %s1092_s15  ;;  %p1251_p5 = pneg %p1250_p4 }
  0x31   : > { %s1349_s13 = smov [#allocation2]  }
  0x32   : > { %1134 = vmatmul.mubr.msk.bf16.vlgmr.msra.gmra.mrb[4].mxu1 %vm394_vm2, %v1076_v7  ;;  %858 = vperm.xlu0 %1244, %v855_v8   ;;  %s1252_s14 = sshll.u32 %s1349_s13, 4  ;;  %s1253_s14 = int_to_ptr.vmem [resolvable:$false] %s1252_s14 }
  0x33   : > { %1145 = vmatprep.mubr.msk.bf16.mxu1 %vm1345_vm0, %v1344_v0  ;;  %s1254_s19 = scalar_lea.vmem %s1253_s14, 256  ;;  %p1255_p6 = scmp.lt.s32.totalorder %s895_s18, %s1253_s14 }
  0x34   : > { %p1256_p7 = scmp.lt.s32.totalorder %s1254_s19, %s1248_s12 }
  0x36   : > { %p1257_p9 = por %p1256_p7, %p1255_p6 }
  0x38   : > { %p1258_p10 = pnand %p1257_p9, %p1251_p5 }
  0x98   : > { %v393_v10 = vpop.permute.xlu0 %392 }
  0x99   : > { %v400_v11 = vsel %vm398_vm1, %v393_v10, 0 }
  0x9a   : > { %1114 = vmatpush3.bf16.msra.mxu0 %v400_v11  ;;  %v598_v15 = vpop.permute.xlu1 %597 }
  0x9b   : > { %1125 = vmatprep.subr.bf16.mxu0 %v1344_v0  ;;  %v603_v17 = vsel %vm398_vm1, %v598_v15, 0 }
  0x9c   : > { %v491_v13 = vpop.permute.xlu0 %490 }
  0x9d   : > { %v496_v14 = vsel %vm398_vm1, %v491_v13, 0  ;;  %1116 = vmatmul.mubr.msk.bf16.vlgmr.msra.gmra.mrb[0].mxu0 %vm394_vm2, %v1070_v12 }
  0x9e   : > { %1126 = vmatpush3.bf16.msra.mxu0 %v496_v14  ;;  %1127 = vmatprep.mubr.msk.bf16.mxu0 %vm1345_vm0, %v1344_v0  ;;  %v649_v18 = vpop.permute.xlu1 %648 }
  0x9f   : > { %1137 = vmatprep.subr.bf16.mxu0 %v1344_v0  ;;  %v654_v20 = vsel %vm398_vm1, %v649_v18, 0 }
  0xa0   : > { %v756_v19 = vpop.permute.xlu0 %755  ;;  %1144 = vmatpush3.bf16.msra.mxu1 %v654_v20 }
  0xa1   : > { %v761_v22 = vsel %vm398_vm1, %v756_v19, 0  ;;  %1155 = vmatprep.subr.bf16.mxu1 %v1344_v0 }
  0xa2   : > { %v807_v26 = vpop.permute.xlu1 %806 }
  0xa3   : > { %1146 = vmatmul.mubr.msk.bf16.vlgmr.msra.gmra.mrb[8].mxu1 %vm394_vm2, %v1081_v21  ;;  %v812_v28 = vsel %vm398_vm1, %v807_v26, 0 }
  0xa4   : > { %1156 = vmatpush3.bf16.msra.mxu1 %v761_v22  ;;  %1157 = vmatprep.mubr.msk.bf16.mxu1 %vm1345_vm0, %v1344_v0 }
  0xa5   : > { %1128 = vmatmul.mubr.msk.bf16.vlgmr.msra.gmra.mrb[4].mxu0 %vm394_vm2, %v1074_v16 }
  0xa6   : > { %1138 = vmatpush3.bf16.msra.mxu0 %v603_v17  ;;  %1139 = vmatprep.mubr.msk.bf16.mxu0 %vm1345_vm0, %v1344_v0 }
  0xa7   : > { %1149 = vmatprep.subr.bf16.mxu0 %v1344_v0 }
  0xab   : > { %1158 = vmatmul.mubr.msk.bf16.vlgmr.msra.gmra.mrb[12].mxu1 %vm394_vm2, %v1086_v25 }
  0xad   : > { %1140 = vmatmul.mubr.msk.bf16.vlgmr.msra.gmra.mrb[8].mxu0 %vm394_vm2, %v1079_v23 }
  0xae   : > { %1150 = vmatpush3.bf16.msra.mxu0 %v710_v24  ;;  %1151 = vmatprep.mubr.msk.bf16.mxu0 %vm1345_vm0, %v1344_v0 }
  0xaf   : > { %1161 = vmatprep.subr.bf16.mxu0 %v1344_v0 }
  0xb1   : > { %v859_v6 = vpop.permute.xlu0 %858 }
  0xb5   : > { %1152 = vmatmul.mubr.msk.bf16.vlgmr.msra.gmra.mrb[12].mxu0 %vm394_vm2, %v1083_v27 }
  0xb6   : > { %1162 = vmatpush3.bf16.msra.mxu0 %v812_v28  ;;  %1163 = vmatprep.mubr.msk.bf16.mxu0 %vm1345_vm0, %v1344_v0 }
  0xbd   : > { %1164 = vmatmul.mubr.msk.bf16.vlgmr.msra.gmra.mrb[16].mxu0 %vm394_vm2, %v1088_v29 }
  0xfd   : > { %v482_v30 = vpop.f32.mrb[0].mxu1 }
  0xfe   : > { %v1123_v31 = vpop.f32.mrb[1].mxu1 }
  0xff   : > { %v485_v32 = vpop.f32.mrb[2].mxu1 }
 0x100   : > { %v1124_v33 = vpop.f32.mrb[3].mxu1 }
 0x105   : > { %v588_v34 = vpop.f32.mrb[4].mxu1 }
 0x106   : > { %v1135_v35 = vpop.f32.mrb[5].mxu1 }
 0x107   : > { %v591_v36 = vpop.f32.mrb[6].mxu1 }
 0x108   : > { %v1136_v37 = vpop.f32.mrb[7].mxu1 }
 0x170   : > { %v436_v38 = vpop.f32.mrb[0].mxu0 }
 0x171   : > { %v1117_v39 = vpop.f32.mrb[1].mxu0  ;;  %v483_v40 = vadd.f32 %v482_v30, %v436_v38 }
 0x172   : > { %v439_v41 = vpop.f32.mrb[2].mxu0 }
 0x173   : > { %v1118_v42 = vpop.f32.mrb[3].mxu0 }
 0x176   : > { %v690_v49 = vpop.f32.mrb[8].mxu1 }
 0x177   : > { %v1147_v50 = vpop.f32.mrb[9].mxu1 }
 0x178   : > { %v532_v43 = vpop.f32.mrb[4].mxu0  ;;  %v693_v51 = vpop.f32.mrb[10].mxu1 }
 0x179   : > { %v538_v44 = vadd.f32 %v532_v43, %v483_v40  ;;  %v1129_v45 = vpop.f32.mrb[5].mxu0  ;;  %v1148_v52 = vpop.f32.mrb[11].mxu1 }
 0x17a   : > { %v535_v46 = vpop.f32.mrb[6].mxu0 }
 0x17b   : > { %v594_v47 = vadd.f32 %v588_v34, %v538_v44  ;;  %v1130_v48 = vpop.f32.mrb[7].mxu0 }
 0x17e   : > { %v797_v59 = vpop.f32.mrb[12].mxu1 }
 0x17f   : > { %v1159_v60 = vpop.f32.mrb[13].mxu1 }
 0x180   : > { %v639_v53 = vpop.f32.mrb[8].mxu0  ;;  %v800_v61 = vpop.f32.mrb[14].mxu1 }
 0x181   : > { %v645_v54 = vadd.f32 %v639_v53, %v594_v47  ;;  %v1141_v55 = vpop.f32.mrb[9].mxu0  ;;  %v1160_v62 = vpop.f32.mrb[15].mxu1 }
 0x182   : > { %v642_v56 = vpop.f32.mrb[10].mxu0 }
 0x183   : > { %v696_v57 = vadd.f32 %v690_v49, %v645_v54  ;;  %v1142_v58 = vpop.f32.mrb[11].mxu0 }
 0x188   : > { %v746_v63 = vpop.f32.mrb[12].mxu0 }
 0x189   : > { %v752_v0 = vadd.f32 %v746_v63, %v696_v57  ;;  %v1153_v1 = vpop.f32.mrb[13].mxu0 }
 0x18a   : > { %v749_v2 = vpop.f32.mrb[14].mxu0 }
 0x18b   : > { %v803_v3 = vadd.f32 %v797_v59, %v752_v0  ;;  %v1154_v4 = vpop.f32.mrb[15].mxu0 }
 0x190   : > { %v848_v5 = vpop.f32.mrb[16].mxu0 }
 0x191   : > { %v854_v7 = vadd.f32 %v848_v5, %v803_v3  ;;  %v1165_v8 = vpop.f32.mrb[17].mxu0 }
 0x192   : > { %v851_v9 = vpop.f32.mrb[18].mxu0 }
 0x193   : > { %v861_v10 = vadd.f32 %v859_v6, %v854_v7  ;;  %v1166_v11 = vpop.f32.mrb[19].mxu0 }
 0x195   : > { %v862_v12 = vmax.f32 %v861_v10, 0.0 }
 0x197   : > { %v865_v13 = vsel %vm863_vm3, %v862_v12, 0.0  ;;  %864 = vst.msk [vmem:[%s331_s26] sm:$0xff] %vm863_vm3, %v862_v12 }
 0x198   : > { %866 = vadd.xlane.f32.xlu1 %v865_v13 }
 0x199   : > { %1261 = shalt.err (!%p1258_p10)
}
 0x19a   : > { %s1262_s25 = scalar_lea.hbm %s1555_s29, 128  ;;  %s1266_s0 = scalar_lea.hbm %s1613_s5, 1024 }
 0x19b   : > { %p1263_p11 = scmp.ne.s32.totalorder %s1555_s29, %s1262_s25  ;;  %p1267_p0 = scmp.lt.u32.totalorder %s1555_s29, %s1613_s5 }
 0x19c   : > { %p1268_p1 = scmp.lt.u32.totalorder %s1266_s0, %s1262_s25  ;;  %p1270_p4 = scmp.lt.u32.totalorder %s1262_s25, %s1555_s29 }
 0x19d   : > { %p1264_p12 = pnand %p1263_p11, %p1436_p3 }
 0x19e   : > { %p1269_p2 = por %p1268_p1, %p1267_p0 }
 0x19f   : > { %p1265_p13 = pneg %p1264_p12 }
 0x1a0   : > { %p1271_p5 = por %p1270_p4, %p1269_p2 }
 0x1a2   : > { %p1272_p6 = pnand %p1271_p5, %p1265_p13 }
 0x1a4   : > { %1275 = shalt.err (!%p1272_p6)
}
 0x1a5   : > { %1168 = dma.vmem_to_hbm [thread:$0]  (%p1436_p3), %s895_s18, 128, %s1555_s29, %s871_s9   ;;  %vm868_vm4 = vcmask 7168  }
 0x1a6   : > { %p375_p7 = scmp.lt.s32.totalorder %s1326_s24, 3  ;;  %s1068_s7 = sshll.u32 %s1461_s16, 2 }
 0x1a8   : > { %s1650_s24 = smov (!%p375_p7, %s1326_s24), 3 }
 0x1a9   : > { %s378_s8 = sadd.s32 %s1068_s7, %s1650_s24 }
 0x1aa   : > { %s1069_s15 = sshll.u32 %s378_s8, 3 }
 0x1ab   : > { %s380_s12 = scalar_lea.vmem %s1614_s6, %s1069_s15 }
 0x225   : > { %v867_v14 = vpop.xlane.xlu1 %866 }
 0x226   : > { %869 = vst.msk [vmem:[%s380_s12] sm:$0xff] %vm868_vm4, %v867_v14 }
 0x227 PF: > { %p1174_p9 = scmp.ge.s32.totalorder %s1342_s28, 2  ;;  %s909_s10 = sand.u32 1, %s1314_s21  }
 0x228   : > { %s910_s18 = scalar_lea.sflag [#allocation3], %s909_s10 }
 0x229   : > { %p1171_p3 = pnand %p1174_p9, %p1445_p8 }
 0x22b   : > { %1309 = dma.done.wait (!%p1171_p3), %s910_s18, 128  }
 0x22c   : > { %1311 = vsyncadd (!%p1171_p3), %s910_s18, 4294967168  ;;  %s20_s28 = sadd.s32 1, %s1342_s28   ;;  %s1630_s24 = sld [smem:[#allocation5_spill]] }
 0x22d   : > { %p17_p10 = scmp.ge.s32.totalorder %s20_s28, 10   ;;  %s1631_s23 = sld [smem:[#allocation10_spill]] }
 0x22e   : > { %s1632_s16 = sld [smem:[#allocation6_spill]]  ;;  %s1633_s25 = sld [smem:[#allocation7_spill]] }
 0x22f   : > { %s1634_s26 = sld [smem:[#allocation8_spill]]  ;;  %s1635_s27 = sld [smem:[#allocation9_spill]] }
 0x230   : > { %s1636_s21 = smov %s1318_s22  ;;  %19 = sbr.rel (!%p17_p10) target bundleno = 7 (0x7), region = 101 }
 0x232   : > { %s1637_s22 = smov %s1630_s24 }
 0x234   : > { %s1638_s24 = smov %s1632_s16 }
 0x237   :  { %926 = vsyncpa [#allocation3], 1 }
 0x238   :  { %928 = vsyncpa [#allocation3 + $0x1], 1 }

</bundles_post_ra>
